<compile_context>
chip_gen: v5e
topology: v5e:2x2
jax: 0.10.0
libtpu: 0.0.40
codegen_flags: <defaults>
</compile_context>

<pallas_src>
import jax
import jax.numpy as jnp
from jax import lax
from jax.experimental import pallas as pl
from jax.experimental.pallas import tpu as pltpu

IN_FEATURES = 3 * 64 * 64   # 12288
OUT_FEATURES = 6


def _round_up(v, m):
    return ((v + m - 1) // m) * m


def _pick_tiling(batch):
    """Pick (batch tile, scoped-VMEM limit) for the current TPU generation.

    Defaults are safe on every generation (fit inside v7x's 64 MiB physical
    VMEM).  Chips with 128 MiB VMEM (v5e / v6e) get a larger tile and limit to
    amortize the fixed ~0.35-0.6 us per-grid-step cost.
    """
    tb_cap, vmem_limit = 256, 48 << 20            # safe everywhere (incl. v7x)
    try:
        info = pltpu.get_tpu_info()
        vmem_cap = int(getattr(info, "vmem_capacity_bytes", 0) or 0)
        if vmem_cap >= (100 << 20):               # 128 MiB class: v5e / v6e
            tb_cap, vmem_limit = 512, 96 << 20
    except Exception:
        pass                                      # conservative defaults

    if batch <= 8:
        tb = batch                                # single full-extent tile
    else:
        # >= 2 tiles so dimension_semantics=("parallel",) can shard the batch
        # across both TensorCores on v7x; tile rounded to a multiple of 8 to
        # satisfy the (8, 128) sublane/lane tiling constraint.
        tb = min(tb_cap, _round_up(pl.cdiv(batch, 2), 8))
    return tb, vmem_limit


def _linear_kernel(x_ref, w_ref, b_ref, o_ref):
    """One batch tile of y = x @ W^T + b.

    x_ref: (TB, K)   activations for this batch tile (f32 or bf16)
    w_ref: (6, K)    full weight, native layout, resident across the grid
    b_ref: (1, 6)    bias (f32)
    o_ref: (TB, 6)   f32 logits tile
    """
    y = lax.dot_general(
        x_ref[...],
        w_ref[...],
        dimension_numbers=(((1,), (1,)), ((), ())),   # contract K with K -> (TB, 6)
        preferred_element_type=jnp.float32,
    )
    o_ref[...] = (y + b_ref[...]).astype(o_ref.dtype)


def linear_classifier_forward(x, weight, bias, *, use_bf16=False):
    """x: (B, 3, 64, 64); weight: (6, 12288); bias: (6,).

    Returns f32 logits of shape (B, 6), matching
    torch.nn.Linear(3*64*64, 6)(x.view(B, -1)).
    If use_bf16=True, x and W are streamed as bfloat16 (f32 accumulation).
    """
    B = x.shape[0]
    x_flat = x.reshape(B, -1)                       # (B, 12288), row-major == torch .view
    b2d = bias.reshape(1, OUT_FEATURES).astype(jnp.float32)

    if use_bf16:
        x_flat = x_flat.astype(jnp.bfloat16)
        w = weight.astype(jnp.bfloat16)
    else:
        x_flat = x_flat.astype(jnp.float32)
        w = weight.astype(jnp.float32)

    tb, vmem_limit = _pick_tiling(B)
    grid = (pl.cdiv(B, tb),)                        # ragged last block handled by Pallas

    itemsize = jnp.dtype(x_flat.dtype).itemsize
    cost = pl.CostEstimate(
        flops=2 * B * IN_FEATURES * OUT_FEATURES,
        transcendentals=0,
        bytes_accessed=(B * IN_FEATURES * itemsize
                        + OUT_FEATURES * IN_FEATURES * itemsize
                        + B * OUT_FEATURES * 4),
    )

    out = pl.pallas_call(
        _linear_kernel,
        out_shape=jax.ShapeDtypeStruct((B, OUT_FEATURES), jnp.float32),
        grid_spec=pltpu.PrefetchScalarGridSpec(
            num_scalar_prefetch=0,
            grid=grid,
            in_specs=[
                # x: stream (tb, 12288) lane-dense slabs over the batch axis.
                pl.BlockSpec((tb, IN_FEATURES), lambda i: (i, 0)),
                # weight: full (6, 12288) block, constant index -> stays resident.
                pl.BlockSpec((OUT_FEATURES, IN_FEATURES), lambda i: (0, 0)),
                # bias: tiny constant block.
                pl.BlockSpec((1, OUT_FEATURES), lambda i: (0, 0)),
            ],
            out_specs=pl.BlockSpec((tb, OUT_FEATURES), lambda i: (i, 0)),
        ),
        compiler_params=pltpu.CompilerParams(
            dimension_semantics=("parallel",),      # independent batch tiles (megacore-shardable)
            vmem_limit_bytes=vmem_limit,            # explicit budget (v5e default 16 MiB is too small)
        ),
        cost_estimate=cost,
    )(x_flat, w, b2d)

    return out


if __name__ == "__main__":
    key = jax.random.PRNGKey(0)
    k_x, k_w, k_b = jax.random.split(key, 3)

    # Deterministic parameter init mimicking torch.nn.Linear default:
    # uniform(-1/sqrt(in_features), 1/sqrt(in_features)).
    bound = 1.0 / (IN_FEATURES ** 0.5)
    weight = jax.random.uniform(
        k_w, (OUT_FEATURES, IN_FEATURES), jnp.float32, -bound, bound
    )
    bias = jax.random.uniform(
        k_b, (OUT_FEATURES,), jnp.float32, -bound, bound
    )

    # Small deterministic input consistent with the module's expected shape.
    B = 2
    x = jax.random.normal(k_x, (B, 3, 64, 64), jnp.float32)

    ref = x.reshape(B, -1) @ weight.T + bias

    # f32 path (bit-for-bit semantics of the torch module).
    out = linear_classifier_forward(x, weight, bias)
    out = jax.block_until_ready(out)
    assert out.shape == (B, OUT_FEATURES)
    assert jnp.allclose(out, ref, atol=1e-4, rtol=1e-4)

    # Optional bf16 streaming path (looser tolerance — accuracy trade-off flag).
    out_bf16 = jax.block_until_ready(
        linear_classifier_forward(x, weight, bias, use_bf16=True)
    )
    assert out_bf16.shape == (B, OUT_FEATURES)
    assert jnp.allclose(out_bf16, ref, atol=5e-2, rtol=5e-2)

    print("KERNEL_OK")
</pallas_src>

<mosaic_0001>
module attributes {stable_mosaic.version = 11 : i64} {
  func.func @_linear_kernel(%arg0: i32, %arg1: memref<2x12288xf32, #tpu.memory_space<vmem>>, %arg2: memref<6x12288xf32, #tpu.memory_space<vmem>>, %arg3: memref<1x6xf32, #tpu.memory_space<vmem>>, %arg4: memref<2x6xf32, #tpu.memory_space<vmem>>) attributes {dimension_semantics = [#tpu.dimension_semantics<parallel>], iteration_bounds = array<i64: 1>, scalar_prefetch = 0 : i64, scratch_operands = 0 : i64, tpu.core_type = #tpu.core_type<tc>, window_params = [{transform_indices = @transform_0, window_bounds = array<i64: 2, 12288>}, {pipeline_mode = #tpu.pipeline_mode<synchronous>, transform_indices = @transform_1, window_bounds = array<i64: 6, 12288>}, {pipeline_mode = #tpu.pipeline_mode<synchronous>, transform_indices = @transform_2, window_bounds = array<i64: 1, 6>}, {transform_indices = @transform_3, window_bounds = array<i64: 2, 6>}]} {
    %c0 = arith.constant 0 : index
    %c0_0 = arith.constant 0 : index
    %0 = vector.load %arg1[%c0, %c0_0] : memref<2x12288xf32, #tpu.memory_space<vmem>>, vector<2x12288xf32>
    %c0_1 = arith.constant 0 : index
    %c0_2 = arith.constant 0 : index
    %1 = vector.load %arg2[%c0_1, %c0_2] : memref<6x12288xf32, #tpu.memory_space<vmem>>, vector<6x12288xf32>
    %cst = arith.constant dense<0.000000e+00> : vector<2x6xf32>
    %2 = tpu.matmul %0, %1, %cst {dimension_numbers = #tpu.dot_dimension_numbers<[1], [1], [0], [0], [0, 0, 1, 0], [], []>} : vector<2x12288xf32>, vector<6x12288xf32>, vector<2x6xf32> -> vector<2x6xf32>
    %c0_3 = arith.constant 0 : index
    %c0_4 = arith.constant 0 : index
    %3 = vector.load %arg3[%c0_3, %c0_4] : memref<1x6xf32, #tpu.memory_space<vmem>>, vector<1x6xf32>
    %4 = vector.broadcast %3 : vector<1x6xf32> to vector<2x6xf32>
    %5 = arith.addf %2, %4 : vector<2x6xf32>
    %c0_5 = arith.constant 0 : index
    %c0_6 = arith.constant 0 : index
    %6 = vector.load %arg4[%c0_5, %c0_6] : memref<2x6xf32, #tpu.memory_space<vmem>>, vector<2x6xf32>
    tpu.vector_store %arg4[%c0_5, %c0_6], %5 {strides = array<i32>} : memref<2x6xf32, #tpu.memory_space<vmem>>, vector<2x6xf32>,
    return
  }
  func.func @transform_0(%arg0: i32) -> (i32, i32) {
    %c0_i32 = arith.constant 0 : i32
    %c0_i32_0 = arith.constant 0 : i32
    return %arg0, %c0_i32 : i32, i32
  }
  func.func @transform_1(%arg0: i32) -> (i32, i32) {
    %c0_i32 = arith.constant 0 : i32
    %c0_i32_0 = arith.constant 0 : i32
    %c0_i32_1 = arith.constant 0 : i32
    return %c0_i32, %c0_i32_0 : i32, i32
  }
  func.func @transform_2(%arg0: i32) -> (i32, i32) {
    %c0_i32 = arith.constant 0 : i32
    %c0_i32_0 = arith.constant 0 : i32
    %c0_i32_1 = arith.constant 0 : i32
    return %c0_i32, %c0_i32_0 : i32, i32
  }
  func.func @transform_3(%arg0: i32) -> (i32, i32) {
    %c0_i32 = arith.constant 0 : i32
    %c0_i32_0 = arith.constant 0 : i32
    return %arg0, %c0_i32 : i32, i32
  }
}

</mosaic_0001>

<bundles_post_ra>
// kernel: tpu_custom_call.1
= control target key start
LH: loop header
LB: loop body
LE: loop exit
PB: predicated region body
PF: predicated region fallthrough
CT: control target
= control target key end

     0   :  { %8 = vsyncpa [#allocation3], 0  ;;  %s2537_s0 = inlined_call_operand.hbm [shape: f32[2,12288], index: 0, kind: input, shape index: {}]   ;;  %s2538_s1 = inlined_call_operand.hbm [shape: f32[6,12288], index: 1, kind: input, shape index: {}]   ;;  %s2539_s2 = inlined_call_operand.vmem [shape: f32[1,6], index: 2, kind: input, shape index: {}]   ;;  %s2540_s3 = inlined_call_operand.hbm [shape: f32[2,6], index: 3, kind: output, shape index: {}]  }
   0x1   :  { %9 = vsyncpa [#allocation6], 0 }
   0x2   :  { %10 = vsyncpa [#allocation4], 0  ;;  %s16_s14 = sshll.u32 %s2537_s0, 4  ;;  %s2430_s15 = smov [#allocation2]   ;;  %s17_s14 = int_to_ptr.hbm [resolvable:$true] %s16_s14 }
   0x3   :  { %s18_s16 = sshll.u32 %s2430_s15, 4  ;;  %s27_s19 = sshll.u32 %s2538_s1, 4  ;;  %s19_s16 = int_to_ptr.vmem [resolvable:$true] %s18_s16  ;;  %s28_s19 = int_to_ptr.hbm [resolvable:$true] %s27_s19 }
   0x4   :  { %21 = dma.hbm_to_vmem [thread:$0]  %s17_s14, 3072, %s19_s16, [#allocation3]  }
   0x5   :  { %s2431_s20 = smov [#allocation5]  }
   0x6   :  { %s29_s21 = sshll.u32 %s2431_s20, 4  ;;  %s30_s21 = int_to_ptr.vmem [resolvable:$true] %s29_s21 }
   0x7   :  { %32 = dma.hbm_to_vmem [thread:$0]  %s28_s19, 12288, %s30_s21, [#allocation6]  }
   0x8   :  { %2424 = dma.done.wait [#allocation3], 3072  }
   0x9   :  { %2425 = vsyncadd [#allocation3], 4294964224 }
   0xa   :  { %2426 = dma.done.wait [#allocation6], 12288  }
   0xb   :  { %2427 = vsyncadd [#allocation6], 4294955008  ;;  %v69_v0 = vld [vmem:[#allocation5 + $0x10] sm:$0x3f]  ;;  %v67_v1 = vld [vmem:[#allocation5] sm:$0x3f] }
   0xc   :  { %v70_v2 = vld [vmem:[#allocation5 + $0x18] sm:$0x3f]  ;;  %463 = vmatpush.xpose.msra.mxu2 %v69_v0  ;;  %423 = vmatpush.xpose.msra.mxu0 %v67_v1  ;;  %v43_v3 = vld [vmem:[#allocation2] sm:$0xff]  ;;  %v73_v4 = vld [vmem:[#allocation5 + $0x30] sm:$0x3f]  ;;  %s2337_s25 = sshll.u32 %s2540_s3, 4  ;;  %s2338_s25 = int_to_ptr.hbm [resolvable:$true] %s2337_s25 }
   0xd   :  { %v68_v5 = vld [vmem:[#allocation5 + $0x8] sm:$0x3f]  ;;  %483 = vmatpush.xpose.msra.mxu3 %v70_v2  ;;  %191 = vst [vmem:[#allocation1] ss:$4 sm:$0xff] %v43_v3  ;;  %v71_v6 = vld [vmem:[#allocation5 + $0x20] sm:$0x3f] }
   0xe   :  { %v74_v7 = vld [vmem:[#allocation5 + $0x38] sm:$0x3f]  ;;  %443 = vmatpush.xpose.msra.mxu1 %v68_v5  ;;  %v72_v8 = vld [vmem:[#allocation5 + $0x28] sm:$0x3f]  ;;  %v77_v10 = vld [vmem:[#allocation5 + $0x50] sm:$0x3f] }
   0xf   :  { %v44_v9 = vld [vmem:[#allocation2 + $0x8] sm:$0xff]  ;;  %v75_v11 = vld [vmem:[#allocation5 + $0x40] sm:$0x3f]  ;;  %v78_v12 = vld [vmem:[#allocation5 + $0x58] sm:$0x3f]  ;;  %vm2328_vm0 = vcmask 41984  }
  0x10   :  { %543 = vmatpush.xpose.msrb.mxu2 %v73_v4  ;;  %503 = vmatpush.xpose.msrb.mxu0 %v71_v6  ;;  %193 = vst [vmem:[#allocation1 + $0x20] ss:$4 sm:$0xff] %v44_v9  ;;  %v76_v13 = vld [vmem:[#allocation5 + $0x48] sm:$0x3f]  ;;  %v45_v14 = vld [vmem:[#allocation2 + $0x10] sm:$0xff]  ;;  %v46_v20 = vld [vmem:[#allocation2 + $0x18] sm:$0xff] }
  0x11   :  { %563 = vmatpush.xpose.msrb.mxu3 %v74_v7  ;;  %v81_v24 = vld [vmem:[#allocation5 + $0x70] sm:$0x3f]  ;;  %v79_v25 = vld [vmem:[#allocation5 + $0x60] sm:$0x3f]  ;;  %v82_v26 = vld [vmem:[#allocation5 + $0x78] sm:$0x3f] }
  0x12   :  { %523 = vmatpush.xpose.msrb.mxu1 %v72_v8  ;;  %v80_v27 = vld [vmem:[#allocation5 + $0x68] sm:$0x3f]  ;;  %v47_v28 = vld [vmem:[#allocation2 + $0x20] sm:$0xff]  ;;  %v85_v38 = vld [vmem:[#allocation5 + $0x90] sm:$0x3f] }
  0x13   :  { %v48_v29 = vld [vmem:[#allocation2 + $0x28] sm:$0xff]  ;;  %v83_v39 = vld [vmem:[#allocation5 + $0x80] sm:$0x3f]  ;;  %v86_v40 = vld [vmem:[#allocation5 + $0x98] sm:$0x3f] }
  0x14   :  { %v196_v15 = vld.sshfl [vmem:[#allocation1 + $0x10] sm:$0xff pattern:$0x73625140]  ;;  %v194_v16 = vld.sshfl [vmem:[#allocation1] sm:$0xff pattern:$0x73625140] }
  0x15   :  { %464 = vmatmul.f32.vlgmr.msra.gmra.mxu2 %v196_v15  ;;  %424 = vmatmul.f32.vlgmr.msra.gmra.mxu0 %v194_v16  ;;  %v197_v17 = vld.sshfl [vmem:[#allocation1 + $0x18] sm:$0xff pattern:$0x73625140]  ;;  %v195_v18 = vld.sshfl [vmem:[#allocation1 + $0x8] sm:$0xff pattern:$0x73625140] }
  0x16   :  { %484 = vmatmul.f32.vlgmr.msra.gmra.mxu3 %v197_v17  ;;  %444 = vmatmul.f32.vlgmr.msra.gmra.mxu1 %v195_v18  ;;  %202 = vst [vmem:[#allocation1] ss:$4 sm:$0xff] %v45_v14  ;;  %v84_v41 = vld [vmem:[#allocation5 + $0x88] sm:$0x3f]  ;;  %v89_v42 = vld [vmem:[#allocation5 + $0xb0] sm:$0x3f] }
  0x17   :  { %v200_v19 = vld.sshfl [vmem:[#allocation1 + $0x30] sm:$0xff pattern:$0x73625140]  ;;  %623 = vmatpush.xpose.msra.mxu2 %v77_v10  ;;  %v198_v21 = vld.sshfl [vmem:[#allocation1 + $0x20] sm:$0xff pattern:$0x73625140]  ;;  %583 = vmatpush.xpose.msra.mxu0 %v75_v11 }
  0x18   :  { %v201_v22 = vld.sshfl [vmem:[#allocation1 + $0x38] sm:$0xff pattern:$0x73625140]  ;;  %643 = vmatpush.xpose.msra.mxu3 %v78_v12  ;;  %v199_v23 = vld.sshfl [vmem:[#allocation1 + $0x28] sm:$0xff pattern:$0x73625140]  ;;  %603 = vmatpush.xpose.msra.mxu1 %v76_v13 }
  0x19   :  { %203 = vst [vmem:[#allocation1 + $0x20] ss:$4 sm:$0xff] %v46_v20  ;;  %v87_v43 = vld [vmem:[#allocation5 + $0xa0] sm:$0x3f]  ;;  %v49_v44 = vld [vmem:[#allocation2 + $0x30] sm:$0xff]  ;;  %v50_v45 = vld [vmem:[#allocation2 + $0x38] sm:$0xff] }
  0x1a   :  { %v90_v49 = vld [vmem:[#allocation5 + $0xb8] sm:$0x3f]  ;;  %v88_v50 = vld [vmem:[#allocation5 + $0xa8] sm:$0x3f]  ;;  %v93_v56 = vld [vmem:[#allocation5 + $0xd0] sm:$0x3f] }
  0x1b   :  { %v91_v57 = vld [vmem:[#allocation5 + $0xc0] sm:$0x3f]  ;;  %v94_v58 = vld [vmem:[#allocation5 + $0xd8] sm:$0x3f]  ;;  %v92_v59 = vld [vmem:[#allocation5 + $0xc8] sm:$0x3f] }
  0x1c   :  { %v51_v60 = vld [vmem:[#allocation2 + $0x40] sm:$0xff]  ;;  %v52_v61 = vld [vmem:[#allocation2 + $0x48] sm:$0xff]  ;;  %v97_v6 = vld [vmem:[#allocation5 + $0xf0] sm:$0x3f] }
  0x1d   :  { %544 = vmatmul.f32.vlgmr.msrb.gmra.mxu2 %v200_v19  ;;  %504 = vmatmul.f32.vlgmr.msrb.gmra.mxu0 %v198_v21  ;;  %v206_v30 = vld.sshfl [vmem:[#allocation1 + $0x10] sm:$0xff pattern:$0x73625140]  ;;  %v204_v31 = vld.sshfl [vmem:[#allocation1] sm:$0xff pattern:$0x73625140] }
  0x1e   :  { %564 = vmatmul.f32.vlgmr.msrb.gmra.mxu3 %v201_v22  ;;  %524 = vmatmul.f32.vlgmr.msrb.gmra.mxu1 %v199_v23  ;;  %v207_v32 = vld.sshfl [vmem:[#allocation1 + $0x18] sm:$0xff pattern:$0x73625140]  ;;  %v205_v33 = vld.sshfl [vmem:[#allocation1 + $0x8] sm:$0xff pattern:$0x73625140] }
  0x1f   :  { %703 = vmatpush.xpose.msrb.mxu2 %v81_v24  ;;  %663 = vmatpush.xpose.msrb.mxu0 %v79_v25  ;;  %212 = vst [vmem:[#allocation1] ss:$4 sm:$0xff] %v47_v28  ;;  %v95_v7 = vld [vmem:[#allocation5 + $0xe0] sm:$0x3f]  ;;  %v98_v8 = vld [vmem:[#allocation5 + $0xf8] sm:$0x3f] }
  0x20   :  { %723 = vmatpush.xpose.msrb.mxu3 %v82_v26  ;;  %683 = vmatpush.xpose.msrb.mxu1 %v80_v27  ;;  %v210_v34 = vld.sshfl [vmem:[#allocation1 + $0x30] sm:$0xff pattern:$0x73625140]  ;;  %v208_v35 = vld.sshfl [vmem:[#allocation1 + $0x20] sm:$0xff pattern:$0x73625140] }
  0x21   :  { %v211_v36 = vld.sshfl [vmem:[#allocation1 + $0x38] sm:$0xff pattern:$0x73625140]  ;;  %v209_v37 = vld.sshfl [vmem:[#allocation1 + $0x28] sm:$0xff pattern:$0x73625140] }
  0x22   :  { %213 = vst [vmem:[#allocation1 + $0x20] ss:$4 sm:$0xff] %v48_v29  ;;  %v96_v9 = vld [vmem:[#allocation5 + $0xe8] sm:$0x3f]  ;;  %v53_v10 = vld [vmem:[#allocation2 + $0x50] sm:$0xff]  ;;  %v54_v21 = vld [vmem:[#allocation2 + $0x58] sm:$0xff] }
  0x23   :  { %v101_v14 = vld [vmem:[#allocation5 + $0x110] sm:$0x3f]  ;;  %v99_v15 = vld [vmem:[#allocation5 + $0x100] sm:$0x3f]  ;;  %v102_v22 = vld [vmem:[#allocation5 + $0x118] sm:$0x3f] }
  0x24   :  { %v100_v23 = vld [vmem:[#allocation5 + $0x108] sm:$0x3f]  ;;  %v105_v24 = vld [vmem:[#allocation5 + $0x130] sm:$0x3f]  ;;  %v103_v25 = vld [vmem:[#allocation5 + $0x120] sm:$0x3f] }
  0x25   :  { %624 = vmatmul.f32.vlgmr.msra.gmra.mxu2 %v206_v30  ;;  %584 = vmatmul.f32.vlgmr.msra.gmra.mxu0 %v204_v31  ;;  %v106_v26 = vld [vmem:[#allocation5 + $0x138] sm:$0x3f]  ;;  %v104_v27 = vld [vmem:[#allocation5 + $0x128] sm:$0x3f]  ;;  %v55_v28 = vld [vmem:[#allocation2 + $0x60] sm:$0xff] }
  0x26   :  { %644 = vmatmul.f32.vlgmr.msra.gmra.mxu3 %v207_v32  ;;  %604 = vmatmul.f32.vlgmr.msra.gmra.mxu1 %v205_v33  ;;  %v216_v46 = vld.sshfl [vmem:[#allocation1 + $0x10] sm:$0xff pattern:$0x73625140]  ;;  %v214_v47 = vld.sshfl [vmem:[#allocation1] sm:$0xff pattern:$0x73625140] }
  0x27   :  { %783 = vmatpush.xpose.msra.mxu2 %v85_v38  ;;  %743 = vmatpush.xpose.msra.mxu0 %v83_v39  ;;  %v217_v48 = vld.sshfl [vmem:[#allocation1 + $0x18] sm:$0xff pattern:$0x73625140]  ;;  %v215_v51 = vld.sshfl [vmem:[#allocation1 + $0x8] sm:$0xff pattern:$0x73625140] }
  0x28   :  { %803 = vmatpush.xpose.msra.mxu3 %v86_v40  ;;  %763 = vmatpush.xpose.msra.mxu1 %v84_v41  ;;  %222 = vst [vmem:[#allocation1] ss:$4 sm:$0xff] %v49_v44  ;;  %v109_v33 = vld [vmem:[#allocation5 + $0x150] sm:$0x3f]  ;;  %v56_v39 = vld [vmem:[#allocation2 + $0x68] sm:$0xff] }
  0x29   :  { %v220_v52 = vld.sshfl [vmem:[#allocation1 + $0x30] sm:$0xff pattern:$0x73625140]  ;;  %v218_v53 = vld.sshfl [vmem:[#allocation1 + $0x20] sm:$0xff pattern:$0x73625140] }
  0x2a   :  { %v221_v54 = vld.sshfl [vmem:[#allocation1 + $0x38] sm:$0xff pattern:$0x73625140]  ;;  %v219_v55 = vld.sshfl [vmem:[#allocation1 + $0x28] sm:$0xff pattern:$0x73625140] }
  0x2b   :  { %223 = vst [vmem:[#allocation1 + $0x20] ss:$4 sm:$0xff] %v50_v45  ;;  %v110_v40 = vld [vmem:[#allocation5 + $0x158] sm:$0x3f]  ;;  %v108_v41 = vld [vmem:[#allocation5 + $0x148] sm:$0x3f] }
  0x2c   :  { %v114_v44 = vld [vmem:[#allocation5 + $0x178] sm:$0x3f]  ;;  %v112_v45 = vld [vmem:[#allocation5 + $0x168] sm:$0x3f] }
  0x2d   :  { %704 = vmatmul.f32.vlgmr.msrb.gmra.mxu2 %v210_v34  ;;  %664 = vmatmul.f32.vlgmr.msrb.gmra.mxu0 %v208_v35 }
  0x2e   :  { %724 = vmatmul.f32.vlgmr.msrb.gmra.mxu3 %v211_v36  ;;  %684 = vmatmul.f32.vlgmr.msrb.gmra.mxu1 %v209_v37  ;;  %v107_v37 = vld [vmem:[#allocation5 + $0x140] sm:$0x3f] }
  0x2f   :  { %863 = vmatpush.xpose.msrb.mxu2 %v89_v42  ;;  %823 = vmatpush.xpose.msrb.mxu0 %v87_v43  ;;  %v226_v62 = vld.sshfl [vmem:[#allocation1 + $0x10] sm:$0xff pattern:$0x73625140]  ;;  %v224_v63 = vld.sshfl [vmem:[#allocation1] sm:$0xff pattern:$0x73625140] }
  0x30   :  { %883 = vmatpush.xpose.msrb.mxu3 %v90_v49  ;;  %843 = vmatpush.xpose.msrb.mxu1 %v88_v50  ;;  %v227_v0 = vld.sshfl [vmem:[#allocation1 + $0x18] sm:$0xff pattern:$0x73625140]  ;;  %v225_v1 = vld.sshfl [vmem:[#allocation1 + $0x8] sm:$0xff pattern:$0x73625140] }
  0x31   :  { %232 = vst [vmem:[#allocation1] ss:$4 sm:$0xff] %v51_v60  ;;  %v113_v42 = vld [vmem:[#allocation5 + $0x170] sm:$0x3f]  ;;  %v111_v43 = vld [vmem:[#allocation5 + $0x160] sm:$0x3f] }
  0x32   :  { %v230_v2 = vld.sshfl [vmem:[#allocation1 + $0x30] sm:$0xff pattern:$0x73625140]  ;;  %v228_v3 = vld.sshfl [vmem:[#allocation1 + $0x20] sm:$0xff pattern:$0x73625140] }
  0x33   :  { %v231_v4 = vld.sshfl [vmem:[#allocation1 + $0x38] sm:$0xff pattern:$0x73625140]  ;;  %v229_v5 = vld.sshfl [vmem:[#allocation1 + $0x28] sm:$0xff pattern:$0x73625140] }
  0x34   :  { %233 = vst [vmem:[#allocation1 + $0x20] ss:$4 sm:$0xff] %v52_v61  ;;  %v121_v60 = vld [vmem:[#allocation5 + $0x1b0] sm:$0x3f]  ;;  %v119_v61 = vld [vmem:[#allocation5 + $0x1a0] sm:$0x3f] }
  0x35   :  { %784 = vmatmul.f32.vlgmr.msra.gmra.mxu2 %v216_v46  ;;  %744 = vmatmul.f32.vlgmr.msra.gmra.mxu0 %v214_v47  ;;  %v57_v46 = vld [vmem:[#allocation2 + $0x70] sm:$0xff] }
  0x36   :  { %804 = vmatmul.f32.vlgmr.msra.gmra.mxu3 %v217_v48  ;;  %764 = vmatmul.f32.vlgmr.msra.gmra.mxu1 %v215_v51  ;;  %v117_v51 = vld [vmem:[#allocation5 + $0x190] sm:$0x3f] }
  0x37   :  { %943 = vmatpush.xpose.msra.mxu2 %v93_v56  ;;  %903 = vmatpush.xpose.msra.mxu0 %v91_v57  ;;  %v58_v57 = vld [vmem:[#allocation2 + $0x78] sm:$0xff] }
  0x38   :  { %963 = vmatpush.xpose.msra.mxu3 %v94_v58  ;;  %923 = vmatpush.xpose.msra.mxu1 %v92_v59  ;;  %v236_v11 = vld.sshfl [vmem:[#allocation1 + $0x10] sm:$0xff pattern:$0x73625140]  ;;  %v234_v12 = vld.sshfl [vmem:[#allocation1] sm:$0xff pattern:$0x73625140] }
  0x39   :  { %v237_v13 = vld.sshfl [vmem:[#allocation1 + $0x18] sm:$0xff pattern:$0x73625140]  ;;  %v235_v16 = vld.sshfl [vmem:[#allocation1 + $0x8] sm:$0xff pattern:$0x73625140] }
  0x3a   :  { %242 = vst [vmem:[#allocation1] ss:$4 sm:$0xff] %v53_v10  ;;  %v118_v58 = vld [vmem:[#allocation5 + $0x198] sm:$0x3f]  ;;  %v116_v59 = vld [vmem:[#allocation5 + $0x188] sm:$0x3f] }
  0x3b   :  { %v240_v17 = vld.sshfl [vmem:[#allocation1 + $0x30] sm:$0xff pattern:$0x73625140]  ;;  %v238_v18 = vld.sshfl [vmem:[#allocation1 + $0x20] sm:$0xff pattern:$0x73625140] }
  0x3c   :  { %v241_v19 = vld.sshfl [vmem:[#allocation1 + $0x38] sm:$0xff pattern:$0x73625140]  ;;  %v239_v20 = vld.sshfl [vmem:[#allocation1 + $0x28] sm:$0xff pattern:$0x73625140] }
  0x3d   :  { %864 = vmatmul.f32.vlgmr.msrb.gmra.mxu2 %v220_v52  ;;  %824 = vmatmul.f32.vlgmr.msrb.gmra.mxu0 %v218_v53  ;;  %243 = vst [vmem:[#allocation1 + $0x20] ss:$4 sm:$0xff] %v54_v21  ;;  %v130_v21 = vld [vmem:[#allocation5 + $0x1f8] sm:$0x3f] }
  0x3e   :  { %884 = vmatmul.f32.vlgmr.msrb.gmra.mxu3 %v221_v54  ;;  %844 = vmatmul.f32.vlgmr.msrb.gmra.mxu1 %v219_v55  ;;  %v115_v55 = vld [vmem:[#allocation5 + $0x180] sm:$0x3f] }
  0x3f   :  { %1023 = vmatpush.xpose.msrb.mxu2 %v97_v6  ;;  %983 = vmatpush.xpose.msrb.mxu0 %v95_v7 }
  0x40   :  { %1043 = vmatpush.xpose.msrb.mxu3 %v98_v8  ;;  %1003 = vmatpush.xpose.msrb.mxu1 %v96_v9  ;;  %v123_v9 = vld [vmem:[#allocation5 + $0x1c0] sm:$0x3f] }
  0x41   :  { %v246_v29 = vld.sshfl [vmem:[#allocation1 + $0x10] sm:$0xff pattern:$0x73625140]  ;;  %v244_v30 = vld.sshfl [vmem:[#allocation1] sm:$0xff pattern:$0x73625140] }
  0x42   :  { %v247_v31 = vld.sshfl [vmem:[#allocation1 + $0x18] sm:$0xff pattern:$0x73625140]  ;;  %v245_v32 = vld.sshfl [vmem:[#allocation1 + $0x8] sm:$0xff pattern:$0x73625140] }
  0x43   :  { %252 = vst [vmem:[#allocation1] ss:$4 sm:$0xff] %v55_v28 }
  0x44   :  { %v250_v34 = vld.sshfl [vmem:[#allocation1 + $0x30] sm:$0xff pattern:$0x73625140]  ;;  %v248_v35 = vld.sshfl [vmem:[#allocation1 + $0x20] sm:$0xff pattern:$0x73625140] }
  0x45   :  { %944 = vmatmul.f32.vlgmr.msra.gmra.mxu2 %v226_v62  ;;  %904 = vmatmul.f32.vlgmr.msra.gmra.mxu0 %v224_v63  ;;  %v251_v36 = vld.sshfl [vmem:[#allocation1 + $0x38] sm:$0xff pattern:$0x73625140]  ;;  %v249_v38 = vld.sshfl [vmem:[#allocation1 + $0x28] sm:$0xff pattern:$0x73625140] }
  0x46   :  { %964 = vmatmul.f32.vlgmr.msra.gmra.mxu3 %v227_v0  ;;  %924 = vmatmul.f32.vlgmr.msra.gmra.mxu1 %v225_v1  ;;  %253 = vst [vmem:[#allocation1 + $0x20] ss:$4 sm:$0xff] %v56_v39  ;;  %v122_v62 = vld [vmem:[#allocation5 + $0x1b8] sm:$0x3f]  ;;  %v120_v63 = vld [vmem:[#allocation5 + $0x1a8] sm:$0x3f] }
  0x47   :  { %1103 = vmatpush.xpose.msra.mxu2 %v101_v14  ;;  %1063 = vmatpush.xpose.msra.mxu0 %v99_v15  ;;  %v59_v0 = vld [vmem:[#allocation2 + $0x80] sm:$0xff]  ;;  %v129_v14 = vld [vmem:[#allocation5 + $0x1f0] sm:$0x3f]  ;;  %v138_v39 = vld [vmem:[#allocation5 + $0x238] sm:$0x3f] }
  0x48   :  { %1123 = vmatpush.xpose.msra.mxu3 %v102_v22  ;;  %1083 = vmatpush.xpose.msra.mxu1 %v100_v23  ;;  %v128_v22 = vld [vmem:[#allocation5 + $0x1e8] sm:$0x3f]  ;;  %v133_v23 = vld [vmem:[#allocation5 + $0x210] sm:$0x3f] }
  0x4a   :  { %v256_v47 = vld.sshfl [vmem:[#allocation1 + $0x10] sm:$0xff pattern:$0x73625140]  ;;  %v254_v48 = vld.sshfl [vmem:[#allocation1] sm:$0xff pattern:$0x73625140] }
  0x4b   :  { %v257_v49 = vld.sshfl [vmem:[#allocation1 + $0x18] sm:$0xff pattern:$0x73625140]  ;;  %v255_v50 = vld.sshfl [vmem:[#allocation1 + $0x8] sm:$0xff pattern:$0x73625140] }
  0x4c   :  { %262 = vst [vmem:[#allocation1] ss:$4 sm:$0xff] %v57_v46 }
  0x4d   :  { %1024 = vmatmul.f32.vlgmr.msrb.gmra.mxu2 %v230_v2  ;;  %984 = vmatmul.f32.vlgmr.msrb.gmra.mxu0 %v228_v3  ;;  %v260_v52 = vld.sshfl [vmem:[#allocation1 + $0x30] sm:$0xff pattern:$0x73625140]  ;;  %v258_v53 = vld.sshfl [vmem:[#allocation1 + $0x20] sm:$0xff pattern:$0x73625140] }
  0x4e   :  { %1044 = vmatmul.f32.vlgmr.msrb.gmra.mxu3 %v231_v4  ;;  %1004 = vmatmul.f32.vlgmr.msrb.gmra.mxu1 %v229_v5  ;;  %v261_v54 = vld.sshfl [vmem:[#allocation1 + $0x38] sm:$0xff pattern:$0x73625140]  ;;  %v259_v56 = vld.sshfl [vmem:[#allocation1 + $0x28] sm:$0xff pattern:$0x73625140] }
  0x4f   :  { %1183 = vmatpush.xpose.msrb.mxu2 %v105_v24  ;;  %1143 = vmatpush.xpose.msrb.mxu0 %v103_v25  ;;  %263 = vst [vmem:[#allocation1 + $0x20] ss:$4 sm:$0xff] %v58_v57  ;;  %v125_v5 = vld [vmem:[#allocation5 + $0x1d0] sm:$0x3f] }
  0x50   :  { %1203 = vmatpush.xpose.msrb.mxu3 %v106_v26  ;;  %1163 = vmatpush.xpose.msrb.mxu1 %v104_v27  ;;  %v131_v27 = vld [vmem:[#allocation5 + $0x200] sm:$0x3f] }
  0x53   :  { %v266_v1 = vld.sshfl [vmem:[#allocation1 + $0x10] sm:$0xff pattern:$0x73625140]  ;;  %v264_v2 = vld.sshfl [vmem:[#allocation1] sm:$0xff pattern:$0x73625140] }
  0x54   :  { %v267_v3 = vld.sshfl [vmem:[#allocation1 + $0x18] sm:$0xff pattern:$0x73625140]  ;;  %v265_v4 = vld.sshfl [vmem:[#allocation1 + $0x8] sm:$0xff pattern:$0x73625140] }
  0x55   :  { %1104 = vmatmul.f32.vlgmr.msra.gmra.mxu2 %v236_v11  ;;  %1064 = vmatmul.f32.vlgmr.msra.gmra.mxu0 %v234_v12  ;;  %272 = vst [vmem:[#allocation1] ss:$4 sm:$0xff] %v59_v0  ;;  %v60_v11 = vld [vmem:[#allocation2 + $0x88] sm:$0xff]  ;;  %v126_v12 = vld [vmem:[#allocation5 + $0x1d8] sm:$0x3f] }
  0x56   :  { %1124 = vmatmul.f32.vlgmr.msra.gmra.mxu3 %v237_v13  ;;  %1084 = vmatmul.f32.vlgmr.msra.gmra.mxu1 %v235_v16  ;;  %v270_v6 = vld.sshfl [vmem:[#allocation1 + $0x30] sm:$0xff pattern:$0x73625140]  ;;  %v268_v7 = vld.sshfl [vmem:[#allocation1 + $0x20] sm:$0xff pattern:$0x73625140] }
  0x57   :  { %1263 = vmatpush.xpose.msra.mxu2 %v109_v33  ;;  %1223 = vmatpush.xpose.msra.mxu0 %v107_v37  ;;  %v271_v8 = vld.sshfl [vmem:[#allocation1 + $0x38] sm:$0xff pattern:$0x73625140]  ;;  %v269_v10 = vld.sshfl [vmem:[#allocation1 + $0x28] sm:$0xff pattern:$0x73625140] }
  0x58   :  { %1283 = vmatpush.xpose.msra.mxu3 %v110_v40  ;;  %1243 = vmatpush.xpose.msra.mxu1 %v108_v41  ;;  %v124_v13 = vld [vmem:[#allocation5 + $0x1c8] sm:$0x3f]  ;;  %273 = vst [vmem:[#allocation1 + $0x20] ss:$4 sm:$0xff] %v60_v11  ;;  %v2351_v41 = vld [vmem:[%s2539_s2] ss:$0 sm:$0xff] }
  0x59   :  { %v136_v40 = vld [vmem:[#allocation5 + $0x228] sm:$0x3f]  ;;  %s2432_s2 = smov [#allocation7]  }
  0x5a   :  { %s2335_s22 = sshll.u32 %s2432_s2, 4  ;;  %s2336_s22 = int_to_ptr.vmem [resolvable:$true] %s2335_s22 }
  0x5c   :  { %v2459_v15 = vld.sshfl [vmem:[#allocation1 + $0x10] sm:$0xff pattern:$0x73625140]  ;;  %v2461_v16 = vld.sshfl [vmem:[#allocation1] sm:$0xff pattern:$0x73625140] }
  0x5d   :  { %1184 = vmatmul.f32.vlgmr.msrb.gmra.mxu2 %v240_v17  ;;  %1144 = vmatmul.f32.vlgmr.msrb.gmra.mxu0 %v238_v18  ;;  %v2463_v17 = vld.sshfl [vmem:[#allocation1 + $0x18] sm:$0xff pattern:$0x73625140]  ;;  %v127_v18 = vld [vmem:[#allocation5 + $0x1e0] sm:$0x3f] }
  0x5e   :  { %1204 = vmatmul.f32.vlgmr.msrb.gmra.mxu3 %v241_v19  ;;  %1164 = vmatmul.f32.vlgmr.msrb.gmra.mxu1 %v239_v20  ;;  %v2465_v19 = vld.sshfl [vmem:[#allocation1 + $0x8] sm:$0xff pattern:$0x73625140]  ;;  %v61_v20 = vld [vmem:[#allocation2 + $0x90] sm:$0xff] }
  0x5f   :  { %1343 = vmatpush.xpose.msrb.mxu2 %v113_v42  ;;  %1303 = vmatpush.xpose.msrb.mxu0 %v111_v43  ;;  %282 = vst [vmem:[#allocation1] ss:$4 sm:$0xff] %v61_v20  ;;  %v2467_v24 = vld.sshfl [vmem:[#allocation1 + $0x30] sm:$0xff pattern:$0x73625140]  ;;  %v66_v20 = vld [vmem:[#allocation2 + $0xb8] sm:$0xff] }
  0x60   :  { %1363 = vmatpush.xpose.msrb.mxu3 %v114_v44  ;;  %1323 = vmatpush.xpose.msrb.mxu1 %v112_v45  ;;  %v2469_v25 = vld.sshfl [vmem:[#allocation1 + $0x20] sm:$0xff pattern:$0x73625140]  ;;  %v2471_v26 = vld.sshfl [vmem:[#allocation1 + $0x38] sm:$0xff pattern:$0x73625140] }
  0x61   :  { %v2473_v28 = vld.sshfl [vmem:[#allocation1 + $0x28] sm:$0xff pattern:$0x73625140]  ;;  %v141_v43 = vld [vmem:[#allocation5 + $0x250] sm:$0x3f] }
  0x65   :  { %1264 = vmatmul.f32.vlgmr.msra.gmra.mxu2 %v246_v29  ;;  %1224 = vmatmul.f32.vlgmr.msra.gmra.mxu0 %v244_v30  ;;  %v62_v29 = vld [vmem:[#allocation2 + $0x98] sm:$0xff] }
  0x66   :  { %1284 = vmatmul.f32.vlgmr.msra.gmra.mxu3 %v247_v31  ;;  %1244 = vmatmul.f32.vlgmr.msra.gmra.mxu1 %v245_v32  ;;  %v134_v30 = vld [vmem:[#allocation5 + $0x218] sm:$0x3f]  ;;  %v132_v31 = vld [vmem:[#allocation5 + $0x208] sm:$0x3f]  ;;  %283 = vst [vmem:[#allocation1 + $0x20] ss:$4 sm:$0xff] %v62_v29 }
  0x67   :  { %1423 = vmatpush.xpose.msra.mxu2 %v117_v51  ;;  %1383 = vmatpush.xpose.msra.mxu0 %v115_v55  ;;  %v137_v32 = vld [vmem:[#allocation5 + $0x230] sm:$0x3f]  ;;  %v2475_v33 = vld.sshfl [vmem:[#allocation1 + $0x10] sm:$0xff pattern:$0x73625140] }
  0x68   :  { %1443 = vmatpush.xpose.msra.mxu3 %v118_v58  ;;  %1403 = vmatpush.xpose.msra.mxu1 %v116_v59  ;;  %v2481_v37 = vld.sshfl [vmem:[#allocation1 + $0x8] sm:$0xff pattern:$0x73625140]  ;;  %v64_v51 = vld [vmem:[#allocation2 + $0xa8] sm:$0xff]  ;;  %v145_v59 = vld [vmem:[#allocation5 + $0x270] sm:$0x3f] }
  0x6d   :  { %1344 = vmatmul.f32.vlgmr.msrb.gmra.mxu2 %v250_v34  ;;  %1304 = vmatmul.f32.vlgmr.msrb.gmra.mxu0 %v248_v35  ;;  %v2477_v34 = vld.sshfl [vmem:[#allocation1] sm:$0xff pattern:$0x73625140]  ;;  %v2479_v35 = vld.sshfl [vmem:[#allocation1 + $0x18] sm:$0xff pattern:$0x73625140] }
  0x6e   :  { %1364 = vmatmul.f32.vlgmr.msrb.gmra.mxu3 %v251_v36  ;;  %1324 = vmatmul.f32.vlgmr.msrb.gmra.mxu1 %v249_v38  ;;  %v135_v36 = vld [vmem:[#allocation5 + $0x220] sm:$0x3f]  ;;  %v2486_v44 = vld.sshfl [vmem:[#allocation1 + $0x30] sm:$0xff pattern:$0x73625140] }
  0x6f   :  { %1503 = vmatpush.xpose.msrb.mxu2 %v121_v60  ;;  %1463 = vmatpush.xpose.msrb.mxu0 %v119_v61  ;;  %v63_v38 = vld [vmem:[#allocation2 + $0xa0] sm:$0xff] }
  0x70   :  { %1523 = vmatpush.xpose.msrb.mxu3 %v122_v62  ;;  %1483 = vmatpush.xpose.msrb.mxu1 %v120_v63  ;;  %292 = vst [vmem:[#allocation1] ss:$4 sm:$0xff] %v63_v38 }
  0x75   :  { %1424 = vmatmul.f32.vlgmr.msra.gmra.mxu2 %v256_v47  ;;  %1384 = vmatmul.f32.vlgmr.msra.gmra.mxu0 %v254_v48  ;;  %v2488_v47 = vld.sshfl [vmem:[#allocation1 + $0x20] sm:$0xff pattern:$0x73625140]  ;;  %v2490_v48 = vld.sshfl [vmem:[#allocation1 + $0x38] sm:$0xff pattern:$0x73625140] }
  0x76   :  { %1444 = vmatmul.f32.vlgmr.msra.gmra.mxu3 %v257_v49  ;;  %1404 = vmatmul.f32.vlgmr.msra.gmra.mxu1 %v255_v50  ;;  %v139_v49 = vld [vmem:[#allocation5 + $0x240] sm:$0x3f] }
  0x77   :  { %1583 = vmatpush.xpose.msra.mxu2 %v125_v5  ;;  %1543 = vmatpush.xpose.msra.mxu0 %v123_v9  ;;  %v2492_v50 = vld.sshfl [vmem:[#allocation1 + $0x28] sm:$0xff pattern:$0x73625140]  ;;  %v2498_v60 = vld.sshfl [vmem:[#allocation1 + $0x10] sm:$0xff pattern:$0x73625140] }
  0x78   :  { %1603 = vmatpush.xpose.msra.mxu3 %v126_v12  ;;  %1563 = vmatpush.xpose.msra.mxu1 %v124_v13  ;;  %293 = vst [vmem:[#allocation1 + $0x20] ss:$4 sm:$0xff] %v64_v51  ;;  %v2500_v63 = vld.sshfl [vmem:[#allocation1] sm:$0xff pattern:$0x73625140] }
  0x79   :  { %v2502_v0 = vld.sshfl [vmem:[#allocation1 + $0x18] sm:$0xff pattern:$0x73625140]  ;;  %v146_v5 = vld [vmem:[#allocation5 + $0x278] sm:$0x3f] }
  0x7a   :  { %v149_v12 = vld [vmem:[#allocation5 + $0x290] sm:$0x3f] }
  0x7d   :  { %1504 = vmatmul.f32.vlgmr.msrb.gmra.mxu2 %v260_v52  ;;  %1464 = vmatmul.f32.vlgmr.msrb.gmra.mxu0 %v258_v53  ;;  %v142_v53 = vld [vmem:[#allocation5 + $0x258] sm:$0x3f] }
  0x7e   :  { %1524 = vmatmul.f32.vlgmr.msrb.gmra.mxu3 %v261_v54  ;;  %1484 = vmatmul.f32.vlgmr.msrb.gmra.mxu1 %v259_v56  ;;  %v140_v54 = vld [vmem:[#allocation5 + $0x248] sm:$0x3f] }
  0x7f   :  { %1663 = vmatpush.xpose.msrb.mxu2 %v129_v14  ;;  %1623 = vmatpush.xpose.msrb.mxu0 %v127_v18  ;;  %v2510_v13 = vld.sshfl [vmem:[#allocation1 + $0x30] sm:$0xff pattern:$0x73625140]  ;;  %v147_v18 = vld [vmem:[#allocation5 + $0x280] sm:$0x3f] }
  0x80   :  { %1683 = vmatpush.xpose.msrb.mxu3 %v130_v21  ;;  %1643 = vmatpush.xpose.msrb.mxu1 %v128_v22  ;;  %v150_v22 = vld [vmem:[#allocation5 + $0x298] sm:$0x3f] }
  0x85   :  { %1584 = vmatmul.f32.vlgmr.msra.gmra.mxu2 %v266_v1  ;;  %1544 = vmatmul.f32.vlgmr.msra.gmra.mxu0 %v264_v2  ;;  %v143_v1 = vld [vmem:[#allocation5 + $0x260] sm:$0x3f] }
  0x86   :  { %1604 = vmatmul.f32.vlgmr.msra.gmra.mxu3 %v267_v3  ;;  %1564 = vmatmul.f32.vlgmr.msra.gmra.mxu1 %v265_v4  ;;  %v2504_v2 = vld.sshfl [vmem:[#allocation1 + $0x8] sm:$0xff pattern:$0x73625140]  ;;  %v65_v3 = vld [vmem:[#allocation2 + $0xb0] sm:$0xff] }
  0x87   :  { %1743 = vmatpush.xpose.msra.mxu2 %v133_v23  ;;  %1703 = vmatpush.xpose.msra.mxu0 %v131_v27  ;;  %302 = vst [vmem:[#allocation1] ss:$4 sm:$0xff] %v65_v3  ;;  %v148_v23 = vld [vmem:[#allocation5 + $0x288] sm:$0x3f] }
  0x88   :  { %1763 = vmatpush.xpose.msra.mxu3 %v134_v30  ;;  %1723 = vmatpush.xpose.msra.mxu1 %v132_v31  ;;  %v153_v31 = vld [vmem:[#allocation5 + $0x2b0] sm:$0x3f] }
  0x8d   :  { %1664 = vmatmul.f32.vlgmr.msrb.gmra.mxu2 %v270_v6  ;;  %1624 = vmatmul.f32.vlgmr.msrb.gmra.mxu0 %v268_v7  ;;  %v144_v6 = vld [vmem:[#allocation5 + $0x268] sm:$0x3f] }
  0x8e   :  { %1684 = vmatmul.f32.vlgmr.msrb.gmra.mxu3 %v271_v8  ;;  %1644 = vmatmul.f32.vlgmr.msrb.gmra.mxu1 %v269_v10 }
  0x8f   :  { %1823 = vmatpush.xpose.msrb.mxu2 %v137_v32  ;;  %1783 = vmatpush.xpose.msrb.mxu0 %v135_v36  ;;  %v151_v32 = vld [vmem:[#allocation5 + $0x2a0] sm:$0x3f] }
  0x90   :  { %1843 = vmatpush.xpose.msrb.mxu3 %v138_v39  ;;  %1803 = vmatpush.xpose.msrb.mxu1 %v136_v40 }
  0x92   :  { %v425_v42 = vpop.f32.mrf.mxu0 }
  0x93   :  { %v426_v45 = vadd.f32 %v2351_v41, %v425_v42  ;;  %v445_v46 = vpop.f32.mrf.mxu1 }
  0x95   :  { %1744 = vmatmul.f32.vlgmr.msra.gmra.mxu2 %v2459_v15  ;;  %v446_v52 = vadd.f32 %v445_v46, %v426_v45  ;;  %1704 = vmatmul.f32.vlgmr.msra.gmra.mxu0 %v2461_v16  ;;  %v2512_v16 = vld.sshfl [vmem:[#allocation1 + $0x20] sm:$0xff pattern:$0x73625140] }
  0x96   :  { %1764 = vmatmul.f32.vlgmr.msra.gmra.mxu3 %v2463_v17  ;;  %1724 = vmatmul.f32.vlgmr.msra.gmra.mxu1 %v2465_v19  ;;  %v2514_v17 = vld.sshfl [vmem:[#allocation1 + $0x38] sm:$0xff pattern:$0x73625140]  ;;  %v2516_v19 = vld.sshfl [vmem:[#allocation1 + $0x28] sm:$0xff pattern:$0x73625140] }
  0x97   :  { %1903 = vmatpush.xpose.msra.mxu2 %v141_v43  ;;  %1863 = vmatpush.xpose.msra.mxu0 %v139_v49  ;;  %303 = vst [vmem:[#allocation1 + $0x20] ss:$4 sm:$0xff] %v66_v20  ;;  %v157_v43 = vld [vmem:[#allocation5 + $0x2d0] sm:$0x3f]  ;;  %v158_v46 = vld [vmem:[#allocation5 + $0x2d8] sm:$0x3f] }
  0x98   :  { %v465_v55 = vpop.f32.mrf.mxu2  ;;  %1923 = vmatpush.xpose.msra.mxu3 %v142_v53  ;;  %1883 = vmatpush.xpose.msra.mxu1 %v140_v54 }
  0x99   :  { %v466_v56 = vadd.f32 %v465_v55, %v446_v52  ;;  %v485_v57 = vpop.f32.mrf.mxu3  ;;  %v161_v55 = vld [vmem:[#allocation5 + $0x2f0] sm:$0x3f] }
  0x9a   :  { %v505_v58 = vpop.f32.mrf.mxu0 }
  0x9b   :  { %v486_v61 = vadd.f32 %v485_v57, %v466_v56  ;;  %v525_v62 = vpop.f32.mrf.mxu1  ;;  %v159_v56 = vld [vmem:[#allocation5 + $0x2e0] sm:$0x3f] }
  0x9d   :  { %v506_v4 = vadd.f32 %v505_v58, %v486_v61  ;;  %1824 = vmatmul.f32.vlgmr.msrb.gmra.mxu2 %v2467_v24  ;;  %1784 = vmatmul.f32.vlgmr.msrb.gmra.mxu0 %v2469_v25  ;;  %v162_v58 = vld [vmem:[#allocation5 + $0x2f8] sm:$0x3f] }
  0x9e   :  { %1844 = vmatmul.f32.vlgmr.msrb.gmra.mxu3 %v2471_v26  ;;  %1804 = vmatmul.f32.vlgmr.msrb.gmra.mxu1 %v2473_v28 }
  0x9f   :  { %v526_v7 = vadd.f32 %v525_v62, %v506_v4  ;;  %1983 = vmatpush.xpose.msrb.mxu2 %v145_v59  ;;  %1943 = vmatpush.xpose.msrb.mxu0 %v143_v1  ;;  %v160_v59 = vld [vmem:[#allocation5 + $0x2e8] sm:$0x3f] }
  0xa0   :  { %v545_v8 = vpop.f32.mrf.mxu2  ;;  %2003 = vmatpush.xpose.msrb.mxu3 %v146_v5  ;;  %1963 = vmatpush.xpose.msrb.mxu1 %v144_v6  ;;  %v306_v1 = vld.sshfl [vmem:[#allocation1 + $0x10] sm:$0xff pattern:$0x73625140]  ;;  %v307_v5 = vld.sshfl [vmem:[#allocation1 + $0x18] sm:$0xff pattern:$0x73625140] }
  0xa1   :  { %v546_v9 = vadd.f32 %v545_v8, %v526_v7  ;;  %v565_v10 = vpop.f32.mrf.mxu3  ;;  %v305_v6 = vld.sshfl [vmem:[#allocation1 + $0x8] sm:$0xff pattern:$0x73625140] }
  0xa2   :  { %v585_v11 = vpop.f32.mrf.mxu0 }
  0xa3   :  { %v566_v14 = vadd.f32 %v565_v10, %v546_v9  ;;  %v605_v15 = vpop.f32.mrf.mxu1 }
  0xa5   :  { %v586_v21 = vadd.f32 %v585_v11, %v566_v14  ;;  %1904 = vmatmul.f32.vlgmr.msra.gmra.mxu2 %v2475_v33  ;;  %1864 = vmatmul.f32.vlgmr.msra.gmra.mxu0 %v2477_v34  ;;  %v154_v34 = vld [vmem:[#allocation5 + $0x2b8] sm:$0x3f] }
  0xa6   :  { %1924 = vmatmul.f32.vlgmr.msra.gmra.mxu3 %v2479_v35  ;;  %1884 = vmatmul.f32.vlgmr.msra.gmra.mxu1 %v2481_v37  ;;  %v152_v35 = vld [vmem:[#allocation5 + $0x2a8] sm:$0x3f]  ;;  %v308_v14 = vld.sshfl [vmem:[#allocation1 + $0x20] sm:$0xff pattern:$0x73625140] }
  0xa7   :  { %v606_v24 = vadd.f32 %v605_v15, %v586_v21  ;;  %2063 = vmatpush.xpose.msra.mxu2 %v149_v12  ;;  %2023 = vmatpush.xpose.msra.mxu0 %v147_v18  ;;  %v309_v18 = vld.sshfl [vmem:[#allocation1 + $0x28] sm:$0xff pattern:$0x73625140] }
  0xa8   :  { %v625_v25 = vpop.f32.mrf.mxu2  ;;  %2083 = vmatpush.xpose.msra.mxu3 %v150_v22  ;;  %2043 = vmatpush.xpose.msra.mxu1 %v148_v23 }
  0xa9   :  { %v626_v26 = vadd.f32 %v625_v25, %v606_v24  ;;  %v645_v27 = vpop.f32.mrf.mxu3 }
  0xaa   :  { %v665_v28 = vpop.f32.mrf.mxu0 }
  0xab   :  { %v646_v29 = vadd.f32 %v645_v27, %v626_v26  ;;  %v685_v30 = vpop.f32.mrf.mxu1 }
  0xad   :  { %v666_v33 = vadd.f32 %v665_v28, %v646_v29  ;;  %1984 = vmatmul.f32.vlgmr.msrb.gmra.mxu2 %v2486_v44  ;;  %1944 = vmatmul.f32.vlgmr.msrb.gmra.mxu0 %v2488_v47  ;;  %v155_v44 = vld [vmem:[#allocation5 + $0x2c0] sm:$0x3f]  ;;  %v156_v47 = vld [vmem:[#allocation5 + $0x2c8] sm:$0x3f] }
  0xae   :  { %2004 = vmatmul.f32.vlgmr.msrb.gmra.mxu3 %v2490_v48  ;;  %1964 = vmatmul.f32.vlgmr.msrb.gmra.mxu1 %v2492_v50 }
  0xaf   :  { %v686_v36 = vadd.f32 %v685_v30, %v666_v33  ;;  %2143 = vmatpush.xpose.msrb.mxu2 %v153_v31  ;;  %2103 = vmatpush.xpose.msrb.mxu0 %v151_v32 }
  0xb0   :  { %v705_v37 = vpop.f32.mrf.mxu2  ;;  %2163 = vmatpush.xpose.msrb.mxu3 %v154_v34  ;;  %2123 = vmatpush.xpose.msrb.mxu1 %v152_v35 }
  0xb1   :  { %v706_v38 = vadd.f32 %v705_v37, %v686_v36  ;;  %v725_v39 = vpop.f32.mrf.mxu3 }
  0xb2   :  { %v745_v40 = vpop.f32.mrf.mxu0 }
  0xb3   :  { %v726_v41 = vadd.f32 %v725_v39, %v706_v38  ;;  %v765_v42 = vpop.f32.mrf.mxu1 }
  0xb5   :  { %v746_v45 = vadd.f32 %v745_v40, %v726_v41  ;;  %2064 = vmatmul.f32.vlgmr.msra.gmra.mxu2 %v2498_v60  ;;  %2024 = vmatmul.f32.vlgmr.msra.gmra.mxu0 %v2500_v63 }
  0xb6   :  { %2084 = vmatmul.f32.vlgmr.msra.gmra.mxu3 %v2502_v0  ;;  %2044 = vmatmul.f32.vlgmr.msra.gmra.mxu1 %v2504_v2  ;;  %v304_v2 = vld.sshfl [vmem:[#allocation1] sm:$0xff pattern:$0x73625140] }
  0xb7   :  { %v766_v48 = vadd.f32 %v765_v42, %v746_v45  ;;  %2223 = vmatpush.xpose.msra.mxu2 %v157_v43  ;;  %2183 = vmatpush.xpose.msra.mxu0 %v155_v44 }
  0xb8   :  { %v785_v49 = vpop.f32.mrf.mxu2  ;;  %2243 = vmatpush.xpose.msra.mxu3 %v158_v46  ;;  %2203 = vmatpush.xpose.msra.mxu1 %v156_v47 }
  0xb9   :  { %v786_v50 = vadd.f32 %v785_v49, %v766_v48  ;;  %v805_v51 = vpop.f32.mrf.mxu3 }
  0xba   :  { %v825_v52 = vpop.f32.mrf.mxu0 }
  0xbb   :  { %v806_v53 = vadd.f32 %v805_v51, %v786_v50  ;;  %v845_v54 = vpop.f32.mrf.mxu1 }
  0xbd   :  { %v826_v57 = vadd.f32 %v825_v52, %v806_v53  ;;  %2144 = vmatmul.f32.vlgmr.msrb.gmra.mxu2 %v2510_v13  ;;  %2104 = vmatmul.f32.vlgmr.msrb.gmra.mxu0 %v2512_v16  ;;  %v310_v13 = vld.sshfl [vmem:[#allocation1 + $0x30] sm:$0xff pattern:$0x73625140] }
  0xbe   :  { %2164 = vmatmul.f32.vlgmr.msrb.gmra.mxu3 %v2514_v17  ;;  %2124 = vmatmul.f32.vlgmr.msrb.gmra.mxu1 %v2516_v19  ;;  %v311_v17 = vld.sshfl [vmem:[#allocation1 + $0x38] sm:$0xff pattern:$0x73625140] }
  0xbf   :  { %v846_v60 = vadd.f32 %v845_v54, %v826_v57  ;;  %2303 = vmatpush.xpose.msrb.mxu2 %v161_v55  ;;  %2263 = vmatpush.xpose.msrb.mxu0 %v159_v56 }
  0xc0   :  { %v865_v61 = vpop.f32.mrf.mxu2  ;;  %2323 = vmatpush.xpose.msrb.mxu3 %v162_v58  ;;  %2283 = vmatpush.xpose.msrb.mxu1 %v160_v59 }
  0xc1   :  { %v866_v62 = vadd.f32 %v865_v61, %v846_v60  ;;  %v885_v63 = vpop.f32.mrf.mxu3 }
  0xc2   :  { %v905_v0 = vpop.f32.mrf.mxu0 }
  0xc3   :  { %v886_v3 = vadd.f32 %v885_v63, %v866_v62  ;;  %v925_v4 = vpop.f32.mrf.mxu1 }
  0xc5   :  { %v906_v7 = vadd.f32 %v905_v0, %v886_v3  ;;  %2224 = vmatmul.f32.vlgmr.msra.gmra.mxu2 %v306_v1  ;;  %2184 = vmatmul.f32.vlgmr.msra.gmra.mxu0 %v304_v2 }
  0xc6   :  { %2244 = vmatmul.f32.vlgmr.msra.gmra.mxu3 %v307_v5  ;;  %2204 = vmatmul.f32.vlgmr.msra.gmra.mxu1 %v305_v6 }
  0xc7   :  { %v926_v8 = vadd.f32 %v925_v4, %v906_v7 }
  0xc8   :  { %v945_v9 = vpop.f32.mrf.mxu2 }
  0xc9   :  { %v946_v10 = vadd.f32 %v945_v9, %v926_v8  ;;  %v965_v11 = vpop.f32.mrf.mxu3 }
  0xca   :  { %v985_v12 = vpop.f32.mrf.mxu0 }
  0xcb   :  { %v966_v15 = vadd.f32 %v965_v11, %v946_v10  ;;  %v1005_v16 = vpop.f32.mrf.mxu1 }
  0xcd   :  { %v986_v19 = vadd.f32 %v985_v12, %v966_v15  ;;  %2304 = vmatmul.f32.vlgmr.msrb.gmra.mxu2 %v310_v13  ;;  %2264 = vmatmul.f32.vlgmr.msrb.gmra.mxu0 %v308_v14 }
  0xce   :  { %2324 = vmatmul.f32.vlgmr.msrb.gmra.mxu3 %v311_v17  ;;  %2284 = vmatmul.f32.vlgmr.msrb.gmra.mxu1 %v309_v18 }
  0xcf   :  { %v1006_v20 = vadd.f32 %v1005_v16, %v986_v19 }
  0xd0   :  { %v1025_v21 = vpop.f32.mrf.mxu2 }
  0xd1   :  { %v1026_v22 = vadd.f32 %v1025_v21, %v1006_v20  ;;  %v1045_v23 = vpop.f32.mrf.mxu3 }
  0xd2   :  { %v1065_v24 = vpop.f32.mrf.mxu0 }
  0xd3   :  { %v1046_v25 = vadd.f32 %v1045_v23, %v1026_v22  ;;  %v1085_v26 = vpop.f32.mrf.mxu1 }
  0xd5   :  { %v1066_v27 = vadd.f32 %v1065_v24, %v1046_v25 }
  0xd7   :  { %v1086_v28 = vadd.f32 %v1085_v26, %v1066_v27 }
  0xd8   :  { %v1105_v29 = vpop.f32.mrf.mxu2 }
  0xd9   :  { %v1106_v30 = vadd.f32 %v1105_v29, %v1086_v28  ;;  %v1125_v31 = vpop.f32.mrf.mxu3 }
  0xda   :  { %v1145_v32 = vpop.f32.mrf.mxu0 }
  0xdb   :  { %v1126_v33 = vadd.f32 %v1125_v31, %v1106_v30  ;;  %v1165_v34 = vpop.f32.mrf.mxu1 }
  0xdd   :  { %v1146_v35 = vadd.f32 %v1145_v32, %v1126_v33 }
  0xdf   :  { %v1166_v36 = vadd.f32 %v1165_v34, %v1146_v35 }
  0xe0   :  { %v1185_v37 = vpop.f32.mrf.mxu2 }
  0xe1   :  { %v1186_v38 = vadd.f32 %v1185_v37, %v1166_v36  ;;  %v1205_v39 = vpop.f32.mrf.mxu3 }
  0xe2   :  { %v1225_v40 = vpop.f32.mrf.mxu0 }
  0xe3   :  { %v1206_v41 = vadd.f32 %v1205_v39, %v1186_v38  ;;  %v1245_v42 = vpop.f32.mrf.mxu1 }
  0xe5   :  { %v1226_v43 = vadd.f32 %v1225_v40, %v1206_v41 }
  0xe7   :  { %v1246_v44 = vadd.f32 %v1245_v42, %v1226_v43 }
  0xe8   :  { %v1265_v45 = vpop.f32.mrf.mxu2 }
  0xe9   :  { %v1266_v46 = vadd.f32 %v1265_v45, %v1246_v44  ;;  %v1285_v47 = vpop.f32.mrf.mxu3 }
  0xea   :  { %v1305_v48 = vpop.f32.mrf.mxu0 }
  0xeb   :  { %v1286_v49 = vadd.f32 %v1285_v47, %v1266_v46  ;;  %v1325_v50 = vpop.f32.mrf.mxu1 }
  0xed   :  { %v1306_v51 = vadd.f32 %v1305_v48, %v1286_v49 }
  0xef   :  { %v1326_v52 = vadd.f32 %v1325_v50, %v1306_v51 }
  0xf0   :  { %v1345_v53 = vpop.f32.mrf.mxu2 }
  0xf1   :  { %v1346_v54 = vadd.f32 %v1345_v53, %v1326_v52  ;;  %v1365_v55 = vpop.f32.mrf.mxu3 }
  0xf2   :  { %v1385_v56 = vpop.f32.mrf.mxu0 }
  0xf3   :  { %v1366_v57 = vadd.f32 %v1365_v55, %v1346_v54  ;;  %v1405_v58 = vpop.f32.mrf.mxu1 }
  0xf5   :  { %v1386_v59 = vadd.f32 %v1385_v56, %v1366_v57 }
  0xf7   :  { %v1406_v60 = vadd.f32 %v1405_v58, %v1386_v59 }
  0xf8   :  { %v1425_v61 = vpop.f32.mrf.mxu2 }
  0xf9   :  { %v1426_v62 = vadd.f32 %v1425_v61, %v1406_v60  ;;  %v1445_v63 = vpop.f32.mrf.mxu3 }
  0xfa   :  { %v1465_v0 = vpop.f32.mrf.mxu0 }
  0xfb   :  { %v1446_v1 = vadd.f32 %v1445_v63, %v1426_v62  ;;  %v1485_v2 = vpop.f32.mrf.mxu1 }
  0xfd   :  { %v1466_v3 = vadd.f32 %v1465_v0, %v1446_v1 }
  0xff   :  { %v1486_v4 = vadd.f32 %v1485_v2, %v1466_v3 }
 0x100   :  { %v1505_v5 = vpop.f32.mrf.mxu2 }
 0x101   :  { %v1506_v6 = vadd.f32 %v1505_v5, %v1486_v4  ;;  %v1525_v7 = vpop.f32.mrf.mxu3 }
 0x102   :  { %v1545_v8 = vpop.f32.mrf.mxu0 }
 0x103   :  { %v1526_v9 = vadd.f32 %v1525_v7, %v1506_v6  ;;  %v1565_v10 = vpop.f32.mrf.mxu1 }
 0x105   :  { %v1546_v11 = vadd.f32 %v1545_v8, %v1526_v9 }
 0x107   :  { %v1566_v12 = vadd.f32 %v1565_v10, %v1546_v11 }
 0x108   :  { %v1585_v13 = vpop.f32.mrf.mxu2 }
 0x109   :  { %v1586_v14 = vadd.f32 %v1585_v13, %v1566_v12  ;;  %v1605_v15 = vpop.f32.mrf.mxu3 }
 0x10a   :  { %v1625_v16 = vpop.f32.mrf.mxu0 }
 0x10b   :  { %v1606_v17 = vadd.f32 %v1605_v15, %v1586_v14  ;;  %v1645_v18 = vpop.f32.mrf.mxu1 }
 0x10d   :  { %v1626_v19 = vadd.f32 %v1625_v16, %v1606_v17 }
 0x10f   :  { %v1646_v20 = vadd.f32 %v1645_v18, %v1626_v19 }
 0x110   :  { %v1665_v21 = vpop.f32.mrf.mxu2 }
 0x111   :  { %v1666_v22 = vadd.f32 %v1665_v21, %v1646_v20  ;;  %v1685_v23 = vpop.f32.mrf.mxu3 }
 0x112   :  { %v1705_v24 = vpop.f32.mrf.mxu0 }
 0x113   :  { %v1686_v25 = vadd.f32 %v1685_v23, %v1666_v22  ;;  %v1725_v26 = vpop.f32.mrf.mxu1 }
 0x115   :  { %v1706_v27 = vadd.f32 %v1705_v24, %v1686_v25 }
 0x117   :  { %v1726_v28 = vadd.f32 %v1725_v26, %v1706_v27 }
 0x118   :  { %v1745_v29 = vpop.f32.mrf.mxu2 }
 0x119   :  { %v1746_v30 = vadd.f32 %v1745_v29, %v1726_v28  ;;  %v1765_v31 = vpop.f32.mrf.mxu3 }
 0x11a   :  { %v1785_v32 = vpop.f32.mrf.mxu0 }
 0x11b   :  { %v1766_v33 = vadd.f32 %v1765_v31, %v1746_v30  ;;  %v1805_v34 = vpop.f32.mrf.mxu1 }
 0x11d   :  { %v1786_v35 = vadd.f32 %v1785_v32, %v1766_v33 }
 0x11f   :  { %v1806_v36 = vadd.f32 %v1805_v34, %v1786_v35 }
 0x120   :  { %v1825_v37 = vpop.f32.mrf.mxu2 }
 0x121   :  { %v1826_v38 = vadd.f32 %v1825_v37, %v1806_v36  ;;  %v1845_v39 = vpop.f32.mrf.mxu3 }
 0x122   :  { %v1865_v40 = vpop.f32.mrf.mxu0 }
 0x123   :  { %v1846_v41 = vadd.f32 %v1845_v39, %v1826_v38  ;;  %v1885_v42 = vpop.f32.mrf.mxu1 }
 0x125   :  { %v1866_v43 = vadd.f32 %v1865_v40, %v1846_v41 }
 0x127   :  { %v1886_v44 = vadd.f32 %v1885_v42, %v1866_v43 }
 0x128   :  { %v1905_v45 = vpop.f32.mrf.mxu2 }
 0x129   :  { %v1906_v46 = vadd.f32 %v1905_v45, %v1886_v44  ;;  %v1925_v47 = vpop.f32.mrf.mxu3 }
 0x12a   :  { %v1945_v48 = vpop.f32.mrf.mxu0 }
 0x12b   :  { %v1926_v49 = vadd.f32 %v1925_v47, %v1906_v46  ;;  %v1965_v50 = vpop.f32.mrf.mxu1 }
 0x12d   :  { %v1946_v51 = vadd.f32 %v1945_v48, %v1926_v49 }
 0x12f   :  { %v1966_v52 = vadd.f32 %v1965_v50, %v1946_v51 }
 0x130   :  { %v1985_v53 = vpop.f32.mrf.mxu2 }
 0x131   :  { %v1986_v54 = vadd.f32 %v1985_v53, %v1966_v52  ;;  %v2005_v55 = vpop.f32.mrf.mxu3 }
 0x132   :  { %v2025_v56 = vpop.f32.mrf.mxu0 }
 0x133   :  { %v2006_v57 = vadd.f32 %v2005_v55, %v1986_v54  ;;  %v2045_v58 = vpop.f32.mrf.mxu1 }
 0x135   :  { %v2026_v59 = vadd.f32 %v2025_v56, %v2006_v57 }
 0x137   :  { %v2046_v60 = vadd.f32 %v2045_v58, %v2026_v59 }
 0x138   :  { %v2065_v61 = vpop.f32.mrf.mxu2 }
 0x139   :  { %v2066_v62 = vadd.f32 %v2065_v61, %v2046_v60  ;;  %v2085_v63 = vpop.f32.mrf.mxu3 }
 0x13a   :  { %v2105_v0 = vpop.f32.mrf.mxu0 }
 0x13b   :  { %v2086_v1 = vadd.f32 %v2085_v63, %v2066_v62  ;;  %v2125_v2 = vpop.f32.mrf.mxu1 }
 0x13d   :  { %v2106_v3 = vadd.f32 %v2105_v0, %v2086_v1 }
 0x13f   :  { %v2126_v4 = vadd.f32 %v2125_v2, %v2106_v3 }
 0x140   :  { %v2145_v5 = vpop.f32.mrf.mxu2 }
 0x141   :  { %v2146_v6 = vadd.f32 %v2145_v5, %v2126_v4  ;;  %v2165_v7 = vpop.f32.mrf.mxu3 }
 0x142   :  { %v2185_v8 = vpop.f32.mrf.mxu0 }
 0x143   :  { %v2166_v9 = vadd.f32 %v2165_v7, %v2146_v6  ;;  %v2205_v10 = vpop.f32.mrf.mxu1 }
 0x145   :  { %v2186_v11 = vadd.f32 %v2185_v8, %v2166_v9 }
 0x147   :  { %v2206_v12 = vadd.f32 %v2205_v10, %v2186_v11 }
 0x148   :  { %v2225_v13 = vpop.f32.mrf.mxu2 }
 0x149   :  { %v2226_v14 = vadd.f32 %v2225_v13, %v2206_v12  ;;  %v2245_v15 = vpop.f32.mrf.mxu3 }
 0x14a   :  { %v2265_v16 = vpop.f32.mrf.mxu0 }
 0x14b   :  { %v2246_v17 = vadd.f32 %v2245_v15, %v2226_v14  ;;  %v2285_v18 = vpop.f32.mrf.mxu1 }
 0x14d   :  { %v2266_v19 = vadd.f32 %v2265_v16, %v2246_v17 }
 0x14f   :  { %v2286_v20 = vadd.f32 %v2285_v18, %v2266_v19 }
 0x150   :  { %v2305_v21 = vpop.f32.mrf.mxu2 }
 0x151   :  { %v2306_v22 = vadd.f32 %v2305_v21, %v2286_v20  ;;  %v2325_v23 = vpop.f32.mrf.mxu3 }
 0x153   :  { %v2326_v24 = vadd.f32 %v2325_v23, %v2306_v22 }
 0x155   :  { %2329 = vst.msk [vmem:[#allocation7] sm:$0x3] %vm2328_vm0, %v2326_v24 }
 0x156   :  { %2340 = dma.vmem_to_hbm [thread:$0]  %s2336_s22, 32, %s2338_s25, [#allocation4]  }
 0x157   :  { %2428 = dma.done.wait [#allocation4], 32  }
 0x158   :  { %2429 = vsyncadd [#allocation4], 4294967264 }
 0x159   :  { %2345 = vsyncpa [#allocation3], 1 }
 0x15a   :  { %2346 = vsyncpa [#allocation6], 1 }
 0x15b   :  { %2347 = vsyncpa [#allocation4], 1 }

</bundles_post_ra>
